<compile_context>
chip_gen: v7x
topology: tpu7x:2x2x1
jax: 0.10.0
libtpu: 0.0.40
codegen_flags: <defaults>
</compile_context>

<pallas_src>
import functools

import jax
import jax.numpy as jnp
from jax.experimental import pallas as pl
from jax.experimental.pallas import tpu as pltpu

_MB = 1024 * 1024


# ---------------------------------------------------------------------------
# Hardware detection (generation-aware tiling / VMEM budgets / quant dtype)
# ---------------------------------------------------------------------------

def _tpu_generation():
    try:
        kind = jax.devices()[0].device_kind.lower()
    except Exception:
        return "unknown"
    if "v5" in kind:
        return "v5e"
    if "v6" in kind:
        return "v6e"
    if "v7" in kind or "7x" in kind:
        return "v7x"
    return "unknown"


_GEN = _tpu_generation()


def _vmem_capacity_bytes():
    try:
        cap = int(getattr(pltpu.get_tpu_info(), "vmem_capacity_bytes"))
        if cap > 0:
            return cap
    except Exception:
        pass
    # Conservative defaults: 64 MiB on v7x / unknown, 128 MiB on v5e/v6e.
    return (64 if _GEN in ("v7x", "unknown") else 128) * _MB


# Leave ~30% headroom for Mosaic internal scratch / misc buffers.
_VMEM_CAP = int(0.7 * _vmem_capacity_bytes())

# Quantized weight dtype for the big (tiled) layers: int8 on v5e/v6e,
# fp8 e4m3 on v7x (its MXU has fp8 but no int path).
_QUANT_DTYPE = jnp.float8_e4m3fn if _GEN == "v7x" else jnp.int8

# Runtime-tunable knobs (a conservative fallback in __main__ may rebind them).
_DIM_SEMANTICS = (pltpu.CORE_PARALLEL,) if _GEN == "v7x" else ("arbitrary",)
_WEIGHT_BUFFERS = 3


# ---------------------------------------------------------------------------
# Kernels
# ---------------------------------------------------------------------------

def _fused_mlp_kernel(*refs, relu_flags):
    """Front-layer MLP with all weights resident in VMEM.

    refs = (x_ref, w0_ref, b0_ref, w1_ref, b1_ref, ..., o_ref)
    """
    x_ref = refs[0]
    o_ref = refs[-1]
    wb_refs = refs[1:-1]
    h = x_ref[...]                                    # (B, Din) f32
    for i, relu in enumerate(relu_flags):
        w = wb_refs[2 * i][...]                       # (Din_i, Dout_i) bf16
        b = wb_refs[2 * i + 1][...]                   # (1, Dout_i) f32
        y = jnp.dot(h.astype(jnp.bfloat16), w,
                    preferred_element_type=jnp.float32) + b
        h = jnp.maximum(y, 0.0) if relu else y
    o_ref[...] = h.astype(o_ref.dtype)


def _tiled_qlinear_kernel(x_ref, w_ref, s_ref, b_ref, o_ref, *, apply_relu):
    """One output-column tile per step: y = (x @ Wq_tile) * scale + b (+ReLU).

    x_ref: (B, Din) bf16, w_ref: (Din, tn) int8/fp8/bf16,
    s_ref/b_ref: (1, tn) f32 per-output-channel scale / bias.
    """
    w = w_ref[...].astype(jnp.bfloat16)     # exact widening cast (int8/fp8 ⊂ bf16)
    y = jnp.dot(x_ref[...], w, preferred_element_type=jnp.float32)
    y = y * s_ref[...] + b_ref[...]         # dequant + bias epilogue on idle VPU
    if apply_relu:
        y = jnp.maximum(y, 0.0)
    o_ref[...] = y.astype(o_ref.dtype)


# ---------------------------------------------------------------------------
# pallas_call wrappers
# ---------------------------------------------------------------------------

def fused_mlp(x, fused_layers):
    """Run a stack of small Linear(+ReLU) layers in a single pallas_call."""
    B = x.shape[0]
    dout = fused_layers[-1][0].shape[1]
    relu_flags = tuple(r for (_w, _b, r) in fused_layers)

    args = [x]
    vmem_need = x.size * x.dtype.itemsize
    for w, b, _r in fused_layers:
        args += [w, b]
        vmem_need += w.size * w.dtype.itemsize + b.size * b.dtype.itemsize
        vmem_need += 2 * B * w.shape[1] * 4          # intermediate activations
    vmem_limit = int(min(_VMEM_CAP, max(16 * _MB, 2 * vmem_need)))

    vmem_spec = pl.BlockSpec(memory_space=pltpu.MemorySpace.VMEM)
    return pl.pallas_call(
        functools.partial(_fused_mlp_kernel, relu_flags=relu_flags),
        out_shape=jax.ShapeDtypeStruct((B, dout), jnp.float32),
        in_specs=[vmem_spec] * len(args),
        out_specs=vmem_spec,
        compiler_params=pltpu.CompilerParams(vmem_limit_bytes=vmem_limit),
    )(*args)


def tiled_linear(x_bf16, w_tiles, s_pad, b_pad, dout, *, apply_relu, tn):
    """y = relu?((x @ Wq) * scale + b) with Wq pre-tiled as (n_tiles, Din, tn)."""
    B, din = x_bf16.shape
    n_tiles, din2, tn2 = w_tiles.shape
    assert din == din2 and tn == tn2
    dout_pad = n_tiles * tn
    assert s_pad.shape == (1, dout_pad) and b_pad.shape == (1, dout_pad)

    w_itemsize = w_tiles.dtype.itemsize
    # Triple-buffer the weight stream when there are enough tiles and VMEM.
    n_buf = _WEIGHT_BUFFERS if n_tiles >= 3 else 2
    if n_buf * din * tn * w_itemsize > int(0.6 * _VMEM_CAP):
        n_buf = 2
    w_spec_kwargs = {}
    if n_buf != 2:
        w_spec_kwargs["pipeline_mode"] = pl.Buffered(n_buf)

    vmem_need = (n_buf * din * tn * w_itemsize       # weight tile buffers
                 + 2 * B * din * 2                   # bf16 activations x2 bufs
                 + 2 * 2 * tn * 4 * 2                # scale + bias tiles
                 + 2 * B * tn * 4)                   # output tiles
    vmem_limit = int(min(_VMEM_CAP, max(16 * _MB, vmem_need + 8 * _MB)))

    out = pl.pallas_call(
        functools.partial(_tiled_qlinear_kernel, apply_relu=apply_relu),
        out_shape=jax.ShapeDtypeStruct((B, dout_pad), jnp.float32),
        grid_spec=pltpu.PrefetchScalarGridSpec(
            num_scalar_prefetch=0,
            grid=(n_tiles,),
            in_specs=[
                pl.BlockSpec((B, din), lambda j: (0, 0)),              # acts
                pl.BlockSpec((None, din, tn), lambda j: (j, 0, 0),     # Wq tile
                             **w_spec_kwargs),
                pl.BlockSpec((1, tn), lambda j: (0, j)),               # scale
                pl.BlockSpec((1, tn), lambda j: (0, j)),               # bias
            ],
            out_specs=pl.BlockSpec((B, tn), lambda j: (0, j)),
        ),
        compiler_params=pltpu.CompilerParams(
            dimension_semantics=_DIM_SEMANTICS,   # CORE_PARALLEL on v7x
            vmem_limit_bytes=vmem_limit,
        ),
    )(x_bf16, w_tiles, s_pad, b_pad)
    return out[:, :dout] if dout != dout_pad else out


# ---------------------------------------------------------------------------
# Parameters / preparation
# ---------------------------------------------------------------------------

def init_pn_decoder_params(key, latent, filters, num_points):
    """Deterministic synthetic f32 parameters matching PNDecoder.__init__ shapes.

    Weights are stored (D_in, D_out), i.e. transposed vs. PyTorch Linear.weight.
    """
    dims = [latent] + list(filters) + [num_points * 3]
    params = []
    for i in range(len(dims) - 1):
        key, kw, kb = jax.random.split(key, 3)
        scale = 1.0 / jnp.sqrt(jnp.float32(dims[i]))
        w = jax.random.uniform(kw, (dims[i], dims[i + 1]), jnp.float32,
                               minval=-scale, maxval=scale)
        b = jax.random.uniform(kb, (1, dims[i + 1]), jnp.float32,
                               minval=-scale, maxval=scale)
        params.append((w, b))
    return params


def _quantize_weight(w, qdtype):
    """Per-output-channel symmetric quantization. Returns (wq, scale (1,Dout))."""
    absmax = jnp.maximum(jnp.max(jnp.abs(w), axis=0, keepdims=True), 1e-12)
    if jnp.issubdtype(jnp.dtype(qdtype), jnp.integer):
        scale = absmax / 127.0
        wq = jnp.clip(jnp.round(w / scale), -127.0, 127.0).astype(qdtype)
    else:  # fp8 e4m3 (v7x): max normal ~448
        scale = absmax / 448.0
        wq = (w / scale).astype(qdtype)
    return wq, scale.astype(jnp.float32)


def _default_tn(din, w_itemsize):
    tn = _VMEM_CAP // max(1, 5 * din * w_itemsize)
    tn = (tn // 128) * 128
    return int(max(256, min(2048, tn)))


def prepare_decoder_params(params, *, tn=None, max_fused_weight_bytes=16 * _MB,
                           quantize=True):
    """Split the net into a fused bf16 prefix + quantized column-tiled tail.

    Returns dict with:
      "fused": [(w bf16 (Din,Dout), b f32 (1,Dout), relu)]           VMEM resident
      "tiled": [(w_tiles q (n_tiles,Din,tn), scale_pad, b_pad, Dout, relu, tn)]
      "ref_layers": exact replay recipe for the plain-JAX reference.
    """
    n = len(params)
    fused, tiled, ref_layers = [], [], []
    cum = 0
    splitting = False
    for i, (w, b) in enumerate(params):
        relu = i < n - 1
        b32 = b.astype(jnp.float32)
        w_bytes = w.size * 2  # bf16
        if not splitting and cum + w_bytes <= max_fused_weight_bytes:
            wb = w.astype(jnp.bfloat16)
            fused.append((wb, b32, relu))
            ref_layers.append(("dense", wb, b32, relu))
            cum += w_bytes
            continue
        splitting = True
        din, dout = w.shape
        if quantize:
            wq, scale = _quantize_weight(w, _QUANT_DTYPE)
        else:
            wq, scale = w.astype(jnp.bfloat16), jnp.ones((1, dout), jnp.float32)
        layer_tn = tn if tn is not None else _default_tn(din, wq.dtype.itemsize)
        layer_tn = max(128, (int(layer_tn) // 128) * 128)
        layer_tn = min(layer_tn, -(-dout // 128) * 128)
        n_tiles = -(-dout // layer_tn)                   # cdiv; ragged tile padded
        dout_pad = n_tiles * layer_tn
        wq_pad = jnp.zeros((din, dout_pad), wq.dtype).at[:, :dout].set(wq)
        # (n_tiles, Din, tn): each grid step's weight tile is ONE contiguous DMA.
        w_tiles = jnp.transpose(wq_pad.reshape(din, n_tiles, layer_tn), (1, 0, 2))
        s_pad = jnp.ones((1, dout_pad), jnp.float32).at[:, :dout].set(scale)
        b_pad = jnp.zeros((1, dout_pad), jnp.float32).at[:, :dout].set(b32)
        tiled.append((w_tiles, s_pad, b_pad, dout, relu, layer_tn))
        ref_layers.append(("qdense", wq, scale, b32, relu))
    return {"fused": fused, "tiled": tiled, "ref_layers": ref_layers}


# ---------------------------------------------------------------------------
# Forward
# ---------------------------------------------------------------------------

def pn_decoder_forward(x, prepped, num_points):
    """x: (B, latent) f32 -> (B, 1, num_points, 3) f32."""
    h = x.astype(jnp.float32)
    if prepped["fused"]:
        h = fused_mlp(h, prepped["fused"])
    for w_tiles, s_pad, b_pad, dout, relu, layer_tn in prepped["tiled"]:
        # Cast activations to bf16 once per layer (wrapper side, not per step).
        h = tiled_linear(h.astype(jnp.bfloat16), w_tiles, s_pad, b_pad, dout,
                         apply_relu=relu, tn=layer_tn)
    B = h.shape[0]
    # Matches PyTorch: x[:, None, :, None].view(B, 1, -1, 3)
    return h.reshape(B, 1, num_points, 3)


def reference_forward(x, prepped, num_points):
    """Plain-JAX reference replaying the SAME compressed weights / math order."""
    h = x.astype(jnp.float32)
    for layer in prepped["ref_layers"]:
        kind = layer[0]
        if kind == "dense":
            _, w, b, relu = layer
            y = jnp.dot(h.astype(jnp.bfloat16), w,
                        preferred_element_type=jnp.float32) + b
        else:  # "qdense"
            _, wq, s, b, relu = layer
            y = jnp.dot(h.astype(jnp.bfloat16), wq.astype(jnp.bfloat16),
                        preferred_element_type=jnp.float32) * s + b
        h = jnp.maximum(y, 0.0) if relu else y
    B = h.shape[0]
    return h.reshape(B, 1, num_points, 3)


if __name__ == "__main__":
    # Small shapes consistent with the module (scaled down from defaults
    # num_points=8000, filters=[512, 1024, 4096, 8192], latent=100).
    B = 2
    latent = 32
    filters = [128, 256, 512, 512]
    num_points = 160  # final linear Dout = 480: ragged vs tn=128 (padded to 512)

    key = jax.random.PRNGKey(0)
    key, kx = jax.random.split(key)
    x = jax.random.normal(kx, (B, latent), jnp.float32)
    params = init_pn_decoder_params(key, latent, filters, num_points)

    def _run(prepped):
        return jax.block_until_ready(pn_decoder_forward(x, prepped, num_points))

    # Small fuse budget / tile so the demo exercises BOTH code paths:
    # layers 1-3 fused; layers 4-5 quantized + column-tiled with tn=128
    # (>=3 tiles each -> Buffered(3) path; last layer ragged -> pad + slice).
    try:
        prepped = prepare_decoder_params(params, tn=128,
                                         max_fused_weight_bytes=400 * 1024)
        out = _run(prepped)
    except Exception:
        # Conservative fallback for runtimes lacking quantized-dtype tiles,
        # Buffered(3) or CORE_PARALLEL: bf16 weights, default double-buffering,
        # no cross-core grid sharding.
        _DIM_SEMANTICS = ("arbitrary",)
        _WEIGHT_BUFFERS = 2
        prepped = prepare_decoder_params(params, tn=128,
                                         max_fused_weight_bytes=400 * 1024,
                                         quantize=False)
        out = _run(prepped)

    assert out.shape == (B, 1, num_points, 3), out.shape

    ref = jax.block_until_ready(reference_forward(x, prepped, num_points))
    assert jnp.allclose(out, ref, atol=2e-3, rtol=2e-3), (
        float(jnp.max(jnp.abs(out - ref))))

    print("KERNEL_OK")
</pallas_src>

<mosaic_0001>
module attributes {stable_mosaic.version = 11 : i64} {
  func.func @_fused_mlp_kernel(%arg0: memref<2x32xf32, #tpu.memory_space<vmem>>, %arg1: memref<32x128xbf16, #tpu.memory_space<vmem>>, %arg2: memref<1x128xf32, #tpu.memory_space<vmem>>, %arg3: memref<128x256xbf16, #tpu.memory_space<vmem>>, %arg4: memref<1x256xf32, #tpu.memory_space<vmem>>, %arg5: memref<256x512xbf16, #tpu.memory_space<vmem>>, %arg6: memref<1x512xf32, #tpu.memory_space<vmem>>, %arg7: memref<2x512xf32, #tpu.memory_space<vmem>>) attributes {dimension_semantics = [], scalar_prefetch = 0 : i64, scratch_operands = 0 : i64, tpu.core_type = #tpu.core_type<tc>} {
    %c0 = arith.constant 0 : index
    %c0_0 = arith.constant 0 : index
    %0 = vector.load %arg0[%c0, %c0_0] : memref<2x32xf32, #tpu.memory_space<vmem>>, vector<2x32xf32>
    %c0_1 = arith.constant 0 : index
    %c0_2 = arith.constant 0 : index
    %1 = vector.load %arg1[%c0_1, %c0_2] : memref<32x128xbf16, #tpu.memory_space<vmem>>, vector<32x128xbf16>
    %c0_3 = arith.constant 0 : index
    %c0_4 = arith.constant 0 : index
    %2 = vector.load %arg2[%c0_3, %c0_4] : memref<1x128xf32, #tpu.memory_space<vmem>>, vector<1x128xf32>
    %3 = arith.truncf %0 : vector<2x32xf32> to vector<2x32xbf16>
    %cst = arith.constant dense<0.000000e+00> : vector<2x128xf32>
    %4 = tpu.matmul %3, %1, %cst {dimension_numbers = #tpu.dot_dimension_numbers<[1], [0], [0], [1], [0, 0, 1, 1], [], []>} : vector<2x32xbf16>, vector<32x128xbf16>, vector<2x128xf32> -> vector<2x128xf32>
    %5 = vector.broadcast %2 : vector<1x128xf32> to vector<2x128xf32>
    %6 = arith.addf %4, %5 : vector<2x128xf32>
    %cst_5 = arith.constant 0.000000e+00 : f32
    %7 = vector.broadcast %cst_5 : f32 to vector<2x128xf32>
    %8 = arith.maximumf %6, %7 : vector<2x128xf32>
    %c0_6 = arith.constant 0 : index
    %c0_7 = arith.constant 0 : index
    %9 = vector.load %arg3[%c0_6, %c0_7] : memref<128x256xbf16, #tpu.memory_space<vmem>>, vector<128x256xbf16>
    %c0_8 = arith.constant 0 : index
    %c0_9 = arith.constant 0 : index
    %10 = vector.load %arg4[%c0_8, %c0_9] : memref<1x256xf32, #tpu.memory_space<vmem>>, vector<1x256xf32>
    %11 = arith.truncf %8 : vector<2x128xf32> to vector<2x128xbf16>
    %cst_10 = arith.constant dense<0.000000e+00> : vector<2x256xf32>
    %12 = tpu.matmul %11, %9, %cst_10 {dimension_numbers = #tpu.dot_dimension_numbers<[1], [0], [0], [1], [0, 0, 1, 1], [], []>} : vector<2x128xbf16>, vector<128x256xbf16>, vector<2x256xf32> -> vector<2x256xf32>
    %13 = vector.broadcast %10 : vector<1x256xf32> to vector<2x256xf32>
    %14 = arith.addf %12, %13 : vector<2x256xf32>
    %cst_11 = arith.constant 0.000000e+00 : f32
    %15 = vector.broadcast %cst_11 : f32 to vector<2x256xf32>
    %16 = arith.maximumf %14, %15 : vector<2x256xf32>
    %c0_12 = arith.constant 0 : index
    %c0_13 = arith.constant 0 : index
    %17 = vector.load %arg5[%c0_12, %c0_13] : memref<256x512xbf16, #tpu.memory_space<vmem>>, vector<256x512xbf16>
    %c0_14 = arith.constant 0 : index
    %c0_15 = arith.constant 0 : index
    %18 = vector.load %arg6[%c0_14, %c0_15] : memref<1x512xf32, #tpu.memory_space<vmem>>, vector<1x512xf32>
    %19 = arith.truncf %16 : vector<2x256xf32> to vector<2x256xbf16>
    %cst_16 = arith.constant dense<0.000000e+00> : vector<2x512xf32>
    %20 = tpu.matmul %19, %17, %cst_16 {dimension_numbers = #tpu.dot_dimension_numbers<[1], [0], [0], [1], [0, 0, 1, 1], [], []>} : vector<2x256xbf16>, vector<256x512xbf16>, vector<2x512xf32> -> vector<2x512xf32>
    %21 = vector.broadcast %18 : vector<1x512xf32> to vector<2x512xf32>
    %22 = arith.addf %20, %21 : vector<2x512xf32>
    %cst_17 = arith.constant 0.000000e+00 : f32
    %23 = vector.broadcast %cst_17 : f32 to vector<2x512xf32>
    %24 = arith.maximumf %22, %23 : vector<2x512xf32>
    %c0_18 = arith.constant 0 : index
    %c0_19 = arith.constant 0 : index
    %25 = vector.load %arg7[%c0_18, %c0_19] : memref<2x512xf32, #tpu.memory_space<vmem>>, vector<2x512xf32>
    tpu.vector_store %arg7[%c0_18, %c0_19], %24 {strides = array<i32>} : memref<2x512xf32, #tpu.memory_space<vmem>>, vector<2x512xf32>,
    return
  }
}

module attributes {stable_mosaic.version = 11 : i64} {
  func.func @_fused_mlp_kernel(%arg0: memref<2x32xf32, #tpu.memory_space<vmem>>, %arg1: memref<32x128xbf16, #tpu.memory_space<vmem>>, %arg2: memref<1x128xf32, #tpu.memory_space<vmem>>, %arg3: memref<128x256xbf16, #tpu.memory_space<vmem>>, %arg4: memref<1x256xf32, #tpu.memory_space<vmem>>, %arg5: memref<256x512xbf16, #tpu.memory_space<vmem>>, %arg6: memref<1x512xf32, #tpu.memory_space<vmem>>, %arg7: memref<2x512xf32, #tpu.memory_space<vmem>>) attributes {dimension_semantics = [], scalar_prefetch = 0 : i64, scratch_operands = 0 : i64, tpu.core_type = #tpu.core_type<tc>} {
    %c0 = arith.constant 0 : index
    %c0_0 = arith.constant 0 : index
    %0 = vector.load %arg0[%c0, %c0_0] : memref<2x32xf32, #tpu.memory_space<vmem>>, vector<2x32xf32>
    %c0_1 = arith.constant 0 : index
    %c0_2 = arith.constant 0 : index
    %1 = vector.load %arg1[%c0_1, %c0_2] : memref<32x128xbf16, #tpu.memory_space<vmem>>, vector<32x128xbf16>
    %c0_3 = arith.constant 0 : index
    %c0_4 = arith.constant 0 : index
    %2 = vector.load %arg2[%c0_3, %c0_4] : memref<1x128xf32, #tpu.memory_space<vmem>>, vector<1x128xf32>
    %3 = arith.truncf %0 : vector<2x32xf32> to vector<2x32xbf16>
    %cst = arith.constant dense<0.000000e+00> : vector<2x128xf32>
    %4 = tpu.matmul %3, %1, %cst {dimension_numbers = #tpu.dot_dimension_numbers<[1], [0], [0], [1], [0, 0, 1, 1], [], []>} : vector<2x32xbf16>, vector<32x128xbf16>, vector<2x128xf32> -> vector<2x128xf32>
    %5 = vector.broadcast %2 : vector<1x128xf32> to vector<2x128xf32>
    %6 = arith.addf %4, %5 : vector<2x128xf32>
    %cst_5 = arith.constant 0.000000e+00 : f32
    %7 = vector.broadcast %cst_5 : f32 to vector<2x128xf32>
    %8 = arith.maximumf %6, %7 : vector<2x128xf32>
    %c0_6 = arith.constant 0 : index
    %c0_7 = arith.constant 0 : index
    %9 = vector.load %arg3[%c0_6, %c0_7] : memref<128x256xbf16, #tpu.memory_space<vmem>>, vector<128x256xbf16>
    %c0_8 = arith.constant 0 : index
    %c0_9 = arith.constant 0 : index
    %10 = vector.load %arg4[%c0_8, %c0_9] : memref<1x256xf32, #tpu.memory_space<vmem>>, vector<1x256xf32>
    %11 = arith.truncf %8 : vector<2x128xf32> to vector<2x128xbf16>
    %cst_10 = arith.constant dense<0.000000e+00> : vector<2x256xf32>
    %12 = tpu.matmul %11, %9, %cst_10 {dimension_numbers = #tpu.dot_dimension_numbers<[1], [0], [0], [1], [0, 0, 1, 1], [], []>} : vector<2x128xbf16>, vector<128x256xbf16>, vector<2x256xf32> -> vector<2x256xf32>
    %13 = vector.broadcast %10 : vector<1x256xf32> to vector<2x256xf32>
    %14 = arith.addf %12, %13 : vector<2x256xf32>
    %cst_11 = arith.constant 0.000000e+00 : f32
    %15 = vector.broadcast %cst_11 : f32 to vector<2x256xf32>
    %16 = arith.maximumf %14, %15 : vector<2x256xf32>
    %c0_12 = arith.constant 0 : index
    %c0_13 = arith.constant 0 : index
    %17 = vector.load %arg5[%c0_12, %c0_13] : memref<256x512xbf16, #tpu.memory_space<vmem>>, vector<256x512xbf16>
    %c0_14 = arith.constant 0 : index
    %c0_15 = arith.constant 0 : index
    %18 = vector.load %arg6[%c0_14, %c0_15] : memref<1x512xf32, #tpu.memory_space<vmem>>, vector<1x512xf32>
    %19 = arith.truncf %16 : vector<2x256xf32> to vector<2x256xbf16>
    %cst_16 = arith.constant dense<0.000000e+00> : vector<2x512xf32>
    %20 = tpu.matmul %19, %17, %cst_16 {dimension_numbers = #tpu.dot_dimension_numbers<[1], [0], [0], [1], [0, 0, 1, 1], [], []>} : vector<2x256xbf16>, vector<256x512xbf16>, vector<2x512xf32> -> vector<2x512xf32>
    %21 = vector.broadcast %18 : vector<1x512xf32> to vector<2x512xf32>
    %22 = arith.addf %20, %21 : vector<2x512xf32>
    %cst_17 = arith.constant 0.000000e+00 : f32
    %23 = vector.broadcast %cst_17 : f32 to vector<2x512xf32>
    %24 = arith.maximumf %22, %23 : vector<2x512xf32>
    %c0_18 = arith.constant 0 : index
    %c0_19 = arith.constant 0 : index
    %25 = vector.load %arg7[%c0_18, %c0_19] : memref<2x512xf32, #tpu.memory_space<vmem>>, vector<2x512xf32>
    tpu.vector_store %arg7[%c0_18, %c0_19], %24 {strides = array<i32>} : memref<2x512xf32, #tpu.memory_space<vmem>>, vector<2x512xf32>,
    return
  }
}

</mosaic_0001>

<bundles_post_ra>
// kernel: tpu_custom_call.1
= control target key start
LH: loop header
LB: loop body
LE: loop exit
PB: predicated region body
PF: predicated region fallthrough
CT: control target
= control target key end

     0   :  { %12 = vsyncpa [#allocation3], 0  ;;  %s1311_s0 = inlined_call_operand.hbm [shape: f32[2,32], index: 0, kind: input, shape index: {}]   ;;  %s1312_s1 = inlined_call_operand.hbm [shape: bf16[32,128], index: 1, kind: input, shape index: {}]   ;;  %s1313_s2 = inlined_call_operand.vmem [shape: f32[1,128], index: 2, kind: input, shape index: {}]   ;;  %s1314_s3 = inlined_call_operand.hbm [shape: bf16[128,256], index: 3, kind: input, shape index: {}]   ;;  %s1315_s4 = inlined_call_operand.vmem [shape: f32[1,256], index: 4, kind: input, shape index: {}]   ;;  %s1316_s5 = inlined_call_operand.hbm [shape: bf16[256,512], index: 5, kind: input, shape index: {}]   ;;  %s1317_s6 = inlined_call_operand.vmem [shape: f32[1,512], index: 6, kind: input, shape index: {}]   ;;  %s1318_s7 = inlined_call_operand.hbm [shape: f32[2,512], index: 7, kind: output, shape index: {}]  }
   0x1   :  { %13 = vsyncpa [#allocation6], 0 }
   0x2   :  { %14 = vsyncpa [#allocation9], 0 }
   0x3   :  { %15 = vsyncpa [#allocation4], 0  ;;  %s1187_s24 = smov [#allocation5]   ;;  %s1069_s28 = scalar_lea.hbm %s1312_s1, 256 }
   0x4   :  { %s31_s25 = sshll.u32 %s1187_s24, 4  ;;  %p1070_p0 = scmp.ne.s32.totalorder %s1312_s1, %s1069_s28  ;;  %s32_s25 = int_to_ptr.vmem [resolvable:$true] %s31_s25 }
   0x5   :  { %p1073_p1 = scmp.lt.u32.totalorder %s1069_s28, %s1312_s1 }
   0x7   :  { %p1075_p2 = pnand %p1073_p1, %p1070_p0 }
   0x9   :  { %1078 = shalt.err (!%p1075_p2)
}
   0xa   :  { %s1079_s10 = scalar_lea.vmem %s32_s25, 256  ;;  %p1084_p4 = scmp.lt.s32.totalorder %s32_s25, %s32_s25 }
   0xb   :  { %p1080_p3 = scmp.ne.s32.totalorder %s32_s25, %s1079_s10  ;;  %p1085_p5 = scmp.lt.s32.totalorder %s1079_s10, %s1079_s10 }
   0xd   :  { %p1086_p6 = por %p1085_p5, %p1084_p4 }
   0xf   :  { %p1087_p7 = pnand %p1086_p6, %p1080_p3 }
  0x11   :  { %1090 = shalt.err (!%p1087_p7)
}
  0x12   :  { %s1188_s11 = smov 64   ;;  %s1189_s12 = smov 4  }
  0x13   :  { %37 = dma.hbm_to_vmem [thread:$0]  %s1312_s1, 256, %s32_s25, [#allocation6], %s1188_s11, %s1188_s11, %s1189_s12  }
  0x14   :  { %s1190_s15 = smov [#allocation2]   ;;  %s1191_s17 = smov [#allocation7]  }
  0x15   :  { %s22_s16 = sshll.u32 %s1190_s15, 4  ;;  %s45_s18 = sshll.u32 %s1191_s17, 4  ;;  %s23_s16 = int_to_ptr.vmem [resolvable:$true] %s22_s16  ;;  %s46_s18 = int_to_ptr.vmem [resolvable:$true] %s45_s18 }
  0x16   :  { %s1091_s21 = scalar_lea.hbm %s1311_s0, 32 }
  0x17   :  { %p1092_p8 = scmp.ne.s32.totalorder %s1311_s0, %s1091_s21  ;;  %p1095_p9 = scmp.lt.u32.totalorder %s1091_s21, %s1311_s0 }
  0x19   :  { %p1097_p10 = pnand %p1095_p9, %p1092_p8 }
  0x1b   :  { %1100 = shalt.err (!%p1097_p10)
}
  0x1c   :  { %s1101_s1 = scalar_lea.vmem %s23_s16, 32  ;;  %p1106_p12 = scmp.lt.s32.totalorder %s23_s16, %s23_s16 }
  0x1d   :  { %p1102_p11 = scmp.ne.s32.totalorder %s23_s16, %s1101_s1  ;;  %p1107_p13 = scmp.lt.s32.totalorder %s1101_s1, %s1101_s1 }
  0x1f   :  { %p1108_p0 = por %p1107_p13, %p1106_p12 }
  0x21   :  { %p1109_p1 = pnand %p1108_p0, %p1102_p11 }
  0x23   :  { %1112 = shalt.err (!%p1109_p1)
}
  0x24   :  { %25 = dma.hbm_to_vmem [thread:$0]  %s1311_s0, 32, %s23_s16, [#allocation3]  }
  0x25   :  { %s1113_s30 = scalar_lea.hbm %s1314_s3, 2048 }
  0x26   :  { %p1114_p2 = scmp.ne.s32.totalorder %s1314_s3, %s1113_s30  ;;  %p1117_p3 = scmp.lt.u32.totalorder %s1113_s30, %s1314_s3 }
  0x28   :  { %p1119_p4 = pnand %p1117_p3, %p1114_p2 }
  0x2a   :  { %1122 = shalt.err (!%p1119_p4)
}
  0x2b   :  { %s1123_s12 = scalar_lea.vmem %s46_s18, 2048  ;;  %p1128_p6 = scmp.lt.s32.totalorder %s46_s18, %s46_s18 }
  0x2c   :  { %p1124_p5 = scmp.ne.s32.totalorder %s46_s18, %s1123_s12  ;;  %p1129_p7 = scmp.lt.s32.totalorder %s1123_s12, %s1123_s12 }
  0x2e   :  { %p1130_p8 = por %p1129_p7, %p1128_p6 }
  0x30   :  { %p1131_p9 = pnand %p1130_p8, %p1124_p5 }
  0x32   :  { %1134 = shalt.err (!%p1131_p9)
}
  0x33   :  { %s1192_s0 = smov 128   ;;  %s1193_s13 = smov 8  }
  0x34   :  { %51 = dma.hbm_to_vmem [thread:$0]  %s1314_s3, 2048, %s46_s18, [#allocation6], %s1192_s0, %s1192_s0, %s1193_s13  }
  0x35   :  { %s1194_s16 = smov [#allocation8]   ;;  %s1135_s21 = scalar_lea.hbm %s1316_s5, 8192 }
  0x36   :  { %s59_s17 = sshll.u32 %s1194_s16, 4  ;;  %p1136_p10 = scmp.ne.s32.totalorder %s1316_s5, %s1135_s21  ;;  %s60_s17 = int_to_ptr.vmem [resolvable:$true] %s59_s17 }
  0x37   :  { %p1139_p11 = scmp.lt.u32.totalorder %s1135_s21, %s1316_s5 }
  0x39   :  { %p1141_p12 = pnand %p1139_p11, %p1136_p10 }
  0x3b   :  { %1144 = shalt.err (!%p1141_p12)
}
  0x3c   :  { %s1145_s1 = scalar_lea.vmem %s60_s17, 8192  ;;  %p1150_p0 = scmp.lt.s32.totalorder %s60_s17, %s60_s17 }
  0x3d   :  { %p1146_p13 = scmp.ne.s32.totalorder %s60_s17, %s1145_s1  ;;  %p1151_p1 = scmp.lt.s32.totalorder %s1145_s1, %s1145_s1 }
  0x3f   :  { %p1152_p2 = por %p1151_p1, %p1150_p0 }
  0x41   :  { %p1153_p3 = pnand %p1152_p2, %p1146_p13 }
  0x43   :  { %1156 = shalt.err (!%p1153_p3)
}
  0x44   :  { %s1195_s3 = smov 256   ;;  %s1196_s18 = smov 16  }
  0x45   :  { %65 = dma.hbm_to_vmem [thread:$0]  %s1316_s5, 8192, %s60_s17, [#allocation9], %s1195_s3, %s1195_s3, %s1196_s18  }
  0x46   :  { %1179 = dma.done.wait [#allocation3], 32  }
  0x47   :  { %1180 = vsyncadd [#allocation3], 4294967264 }
  0x48   :  { %1181 = dma.done.wait [#allocation6], 2304  }
  0x49   :  { %1182 = vsyncadd [#allocation6], 4294964992 }
  0x4a   :  { %1183 = dma.done.wait [#allocation9], 8192  }
  0x4b   :  { %1184 = vsyncadd [#allocation9], 4294959104  ;;  %v1197_v0 = vmov 0.0   ;;  %vm1198_vm0 = vmmov 0   ;;  %v947_v1 = vld [vmem:[#allocation5] sm:$0xff]   ;;  %v948_v2 = vld [vmem:[#allocation5 + $0x8] sm:$0xff]  }
  0x4c   :  { %924 = vmatprep.subr.bf16.mxu0 %v1197_v0  ;;  %928 = vmatprep.mubr.msk.bf16.mxu0 %vm1198_vm0, %v1197_v0  ;;  %v81_v3 = vld [vmem:[#allocation2] sm:$0x3]  ;;  %v951_v5 = vld [vmem:[#allocation7] ss:$8 sps:$4 sm:$0xff]   ;;  %v952_v6 = vld [vmem:[#allocation7 + $0x14] ss:$8 sps:$4 sm:$0xff]  }
  0x4d   :  { %925 = vmatpush3.bf16.msra.mxu0 %v947_v1  ;;  %v949_v4 = vld [vmem:[#allocation7 + $0x4] ss:$8 sps:$4 sm:$0xff]   ;;  %v87_v7 = vpack.c.bf16 %v81_v3, %v81_v3  ;;  %vm106_vm1 = vcmask 261120   ;;  %v954_v8 = vld [vmem:[#allocation7 + $0x10] ss:$8 sps:$4 sm:$0xff]   ;;  %v1199_v21 = vmov 0  }
  0x4e   :  { %926 = vmatprep.subr.bf16.mxu0 %v1197_v0  ;;  %260 = vmatprep.subr.bf16.mxu1 %v949_v4  ;;  %v955_v9 = vld [vmem:[#allocation7 + $0x24] ss:$8 sps:$4 sm:$0xff]   ;;  %v957_v10 = vld [vmem:[#allocation7 + $0x20] ss:$8 sps:$4 sm:$0xff]   ;;  %v958_v11 = vld [vmem:[#allocation7 + $0x34] ss:$8 sps:$4 sm:$0xff]  }
  0x4f   :  { %261 = vmatpush1.bf16.msra.mxu1 %v951_v5  ;;  %v960_v12 = vld [vmem:[#allocation7 + $0x30] ss:$8 sps:$4 sm:$0xff]   ;;  %v961_v13 = vld [vmem:[#allocation7 + $0x44] ss:$8 sps:$4 sm:$0xff]   ;;  %v963_v14 = vld [vmem:[#allocation7 + $0x40] ss:$8 sps:$4 sm:$0xff]   ;;  %292 = vmatprep.mubr.bf16.mxu1 %v1199_v21 }
  0x50   :  { %262 = vmatprep.subr.bf16.mxu1 %v952_v6  ;;  %v964_v15 = vld [vmem:[#allocation7 + $0x54] ss:$8 sps:$4 sm:$0xff]   ;;  %v966_v16 = vld [vmem:[#allocation7 + $0x50] ss:$8 sps:$4 sm:$0xff]   ;;  %v967_v17 = vld [vmem:[#allocation7 + $0x64] ss:$8 sps:$4 sm:$0xff]  }
  0x51   :  { %927 = vmatpush3.bf16.msra.mxu0 %v948_v2  ;;  %v969_v18 = vld [vmem:[#allocation7 + $0x60] ss:$8 sps:$4 sm:$0xff]   ;;  %v970_v19 = vld [vmem:[#allocation7 + $0x74] ss:$8 sps:$4 sm:$0xff]   ;;  %v972_v20 = vld [vmem:[#allocation7 + $0x70] ss:$8 sps:$4 sm:$0xff]  }
  0x52   :  { %v973_v22 = vld [vmem:[#allocation8] ss:$16 sps:$4 sm:$0xff]   ;;  %v975_v23 = vld [vmem:[#allocation8 + $0x4] ss:$16 sps:$4 sm:$0xff]   ;;  %v978_v24 = vld [vmem:[#allocation8 + $0xc] ss:$16 sps:$4 sm:$0xff]  }
  0x53   :  { %263 = vmatpush1.bf16.msra.mxu1 %v954_v8  ;;  %v981_v25 = vld [vmem:[#allocation8 + $0x24] ss:$16 sps:$4 sm:$0xff]   ;;  %711 = vmatprep.subr.bf16.mxu0 %v975_v23  ;;  %v979_v26 = vld [vmem:[#allocation8 + $0x20] ss:$16 sps:$4 sm:$0xff]   ;;  %v976_v58 = vld [vmem:[#allocation8 + $0x8] ss:$16 sps:$4 sm:$0xff]  }
  0x54   :  { %929 = vmatmul.mubr.msk.bf16.vlgmr.msra.gmra.mrb[0].mxu0 %vm106_vm1, %v87_v7  ;;  %264 = vmatprep.subr.bf16.mxu1 %v955_v9  ;;  %v987_v27 = vld [vmem:[#allocation8 + $0x44] ss:$16 sps:$4 sm:$0xff]   ;;  %v985_v28 = vld [vmem:[#allocation8 + $0x40] ss:$16 sps:$4 sm:$0xff]   ;;  %v984_v60 = vld [vmem:[#allocation8 + $0x2c] ss:$16 sps:$4 sm:$0xff]  }
  0x55   :  { %712 = vmatpush1.bf16.msra.mxu0 %v973_v22  ;;  %v993_v29 = vld [vmem:[#allocation8 + $0x64] ss:$16 sps:$4 sm:$0xff]   ;;  %v991_v30 = vld [vmem:[#allocation8 + $0x60] ss:$16 sps:$4 sm:$0xff]   ;;  %v982_v61 = vld [vmem:[#allocation8 + $0x28] ss:$16 sps:$4 sm:$0xff]  }
  0x56   :  { %713 = vmatprep.subr.bf16.mxu0 %v981_v25  ;;  %v999_v31 = vld [vmem:[#allocation8 + $0x84] ss:$16 sps:$4 sm:$0xff]   ;;  %v997_v32 = vld [vmem:[#allocation8 + $0x80] ss:$16 sps:$4 sm:$0xff]   ;;  %v990_v62 = vld [vmem:[#allocation8 + $0x4c] ss:$16 sps:$4 sm:$0xff]  }
  0x57   :  { %265 = vmatpush1.bf16.msra.mxu1 %v957_v10  ;;  %v1005_v33 = vld [vmem:[#allocation8 + $0xa4] ss:$16 sps:$4 sm:$0xff]   ;;  %v1003_v34 = vld [vmem:[#allocation8 + $0xa0] ss:$16 sps:$4 sm:$0xff]   ;;  %v988_v63 = vld [vmem:[#allocation8 + $0x48] ss:$16 sps:$4 sm:$0xff]  }
  0x58   :  { %266 = vmatprep.subr.bf16.mxu1 %v958_v11  ;;  %v1011_v35 = vld [vmem:[#allocation8 + $0xc4] ss:$16 sps:$4 sm:$0xff]   ;;  %v1009_v36 = vld [vmem:[#allocation8 + $0xc0] ss:$16 sps:$4 sm:$0xff]   ;;  %v996_v0 = vld [vmem:[#allocation8 + $0x6c] ss:$16 sps:$4 sm:$0xff]  }
  0x59   :  { %714 = vmatpush1.bf16.msra.mxu0 %v979_v26  ;;  %v1017_v37 = vld [vmem:[#allocation8 + $0xe4] ss:$16 sps:$4 sm:$0xff]   ;;  %v1015_v38 = vld [vmem:[#allocation8 + $0xe0] ss:$16 sps:$4 sm:$0xff]   ;;  %v994_v1 = vld [vmem:[#allocation8 + $0x68] ss:$16 sps:$4 sm:$0xff]  }
  0x5a   :  { %715 = vmatprep.subr.bf16.mxu0 %v987_v27  ;;  %v1023_v39 = vld [vmem:[#allocation8 + $0x104] ss:$16 sps:$4 sm:$0xff]   ;;  %v1021_v40 = vld [vmem:[#allocation8 + $0x100] ss:$16 sps:$4 sm:$0xff]   ;;  %v1002_v2 = vld [vmem:[#allocation8 + $0x8c] ss:$16 sps:$4 sm:$0xff]  }
  0x5b   :  { %267 = vmatpush1.bf16.msra.mxu1 %v960_v12  ;;  %v1029_v41 = vld [vmem:[#allocation8 + $0x124] ss:$16 sps:$4 sm:$0xff]   ;;  %v1027_v42 = vld [vmem:[#allocation8 + $0x120] ss:$16 sps:$4 sm:$0xff]   ;;  %v1000_v3 = vld [vmem:[#allocation8 + $0x88] ss:$16 sps:$4 sm:$0xff]  }
  0x5c   :  { %268 = vmatprep.subr.bf16.mxu1 %v961_v13  ;;  %v1035_v43 = vld [vmem:[#allocation8 + $0x144] ss:$16 sps:$4 sm:$0xff]   ;;  %v1033_v44 = vld [vmem:[#allocation8 + $0x140] ss:$16 sps:$4 sm:$0xff]   ;;  %v1008_v4 = vld [vmem:[#allocation8 + $0xac] ss:$16 sps:$4 sm:$0xff]  }
  0x5d   :  { %716 = vmatpush1.bf16.msra.mxu0 %v985_v28  ;;  %v1041_v45 = vld [vmem:[#allocation8 + $0x164] ss:$16 sps:$4 sm:$0xff]   ;;  %v1039_v46 = vld [vmem:[#allocation8 + $0x160] ss:$16 sps:$4 sm:$0xff]   ;;  %v1006_v5 = vld [vmem:[#allocation8 + $0xa8] ss:$16 sps:$4 sm:$0xff]  }
  0x5e   :  { %717 = vmatprep.subr.bf16.mxu0 %v993_v29  ;;  %v1047_v47 = vld [vmem:[#allocation8 + $0x184] ss:$16 sps:$4 sm:$0xff]   ;;  %v1045_v48 = vld [vmem:[#allocation8 + $0x180] ss:$16 sps:$4 sm:$0xff]   ;;  %v1014_v6 = vld [vmem:[#allocation8 + $0xcc] ss:$16 sps:$4 sm:$0xff]  }
  0x5f   :  { %269 = vmatpush1.bf16.msra.mxu1 %v963_v14  ;;  %v1053_v49 = vld [vmem:[#allocation8 + $0x1a4] ss:$16 sps:$4 sm:$0xff]   ;;  %v1051_v50 = vld [vmem:[#allocation8 + $0x1a0] ss:$16 sps:$4 sm:$0xff]   ;;  %v1012_v7 = vld [vmem:[#allocation8 + $0xc8] ss:$16 sps:$4 sm:$0xff]  }
  0x60   :  { %270 = vmatprep.subr.bf16.mxu1 %v964_v15  ;;  %v837_v51 = vld [vmem:[%s1313_s2] ss:$0 sm:$0xff]  ;;  %v1020_v8 = vld [vmem:[#allocation8 + $0xec] ss:$16 sps:$4 sm:$0xff]   ;;  %v1018_v9 = vld [vmem:[#allocation8 + $0xe8] ss:$16 sps:$4 sm:$0xff]  }
  0x61   :  { %718 = vmatpush1.bf16.msra.mxu0 %v991_v30  ;;  %v1026_v10 = vld [vmem:[#allocation8 + $0x10c] ss:$16 sps:$4 sm:$0xff]   ;;  %v1024_v11 = vld [vmem:[#allocation8 + $0x108] ss:$16 sps:$4 sm:$0xff]   ;;  %v1059_v22 = vld [vmem:[#allocation8 + $0x1c4] ss:$16 sps:$4 sm:$0xff]   ;;  %v170_v30 = vlaneseq }
  0x62   :  { %719 = vmatprep.subr.bf16.mxu0 %v999_v31  ;;  %v1032_v12 = vld [vmem:[#allocation8 + $0x12c] ss:$16 sps:$4 sm:$0xff]   ;;  %v1030_v13 = vld [vmem:[#allocation8 + $0x128] ss:$16 sps:$4 sm:$0xff]   ;;  %v1065_v26 = vld [vmem:[#allocation8 + $0x1e4] ss:$16 sps:$4 sm:$0xff]  }
  0x63   :  { %271 = vmatpush1.bf16.msra.mxu1 %v966_v16  ;;  %v1038_v14 = vld [vmem:[#allocation8 + $0x14c] ss:$16 sps:$4 sm:$0xff]   ;;  %v1036_v15 = vld [vmem:[#allocation8 + $0x148] ss:$16 sps:$4 sm:$0xff]   ;;  %v1063_v28 = vld [vmem:[#allocation8 + $0x1e0] ss:$16 sps:$4 sm:$0xff]  }
  0x64   :  { %272 = vmatprep.subr.bf16.mxu1 %v967_v17  ;;  %v1044_v16 = vld [vmem:[#allocation8 + $0x16c] ss:$16 sps:$4 sm:$0xff]   ;;  %v1042_v17 = vld [vmem:[#allocation8 + $0x168] ss:$16 sps:$4 sm:$0xff]   ;;  %v171_v31 = vshrl.u32 %v170_v30, 7 }
  0x65   :  { %720 = vmatpush1.bf16.msra.mxu0 %v997_v32  ;;  %v1054_v21 = vld [vmem:[#allocation8 + $0x1a8] ss:$16 sps:$4 sm:$0xff]   ;;  %v1062_v23 = vld [vmem:[#allocation8 + $0x1cc] ss:$16 sps:$4 sm:$0xff]  }
  0x66   :  { %721 = vmatprep.subr.bf16.mxu0 %v1005_v33  ;;  %v1060_v25 = vld [vmem:[#allocation8 + $0x1c8] ss:$16 sps:$4 sm:$0xff]   ;;  %v1068_v27 = vld [vmem:[#allocation8 + $0x1ec] ss:$16 sps:$4 sm:$0xff]   ;;  %v172_v32 = vsub.s32 0, %v171_v31 }
  0x67   :  { %273 = vmatpush1.bf16.msra.mxu1 %v969_v18  ;;  %v1050_v18 = vld [vmem:[#allocation8 + $0x18c] ss:$16 sps:$4 sm:$0xff]   ;;  %v1066_v29 = vld [vmem:[#allocation8 + $0x1e8] ss:$16 sps:$4 sm:$0xff]   ;;  %v167_v33 = vld [vmem:[%s1315_s4] sm:$0x3] }
  0x68   :  { %274 = vmatprep.subr.bf16.mxu1 %v970_v19  ;;  %v1048_v19 = vld [vmem:[#allocation8 + $0x188] ss:$16 sps:$4 sm:$0xff]  }
  0x69   :  { %722 = vmatpush1.bf16.msra.mxu0 %v1003_v34  ;;  %v176_v34 = vsub.s32 1, %v171_v31 }
  0x6a   :  { %723 = vmatprep.subr.bf16.mxu0 %v1011_v35  ;;  %v173_v35 = vrot.slane %v167_v33, %v172_v32 }
  0x6b   :  { %275 = vmatpush1.bf16.msra.mxu1 %v972_v20  ;;  %v1056_v20 = vld [vmem:[#allocation8 + $0x1ac] ss:$16 sps:$4 sm:$0xff]  }
  0x6c   :  { %752 = vmatprep.subr.bf16.mxu1 %v978_v24  ;;  %v1057_v24 = vld [vmem:[#allocation8 + $0x1c0] ss:$16 sps:$4 sm:$0xff]  }
  0x6d   :  { %724 = vmatpush1.bf16.msra.mxu0 %v1009_v36  ;;  %v177_v36 = vrot.slane %v167_v33, %v176_v34 }
  0x6e   :  { %725 = vmatprep.subr.bf16.mxu0 %v1017_v37 }
  0x71   :  { %726 = vmatpush1.bf16.msra.mxu0 %v1015_v38 }
  0x72   :  { %727 = vmatprep.subr.bf16.mxu0 %v1023_v39 }
  0x75   :  { %728 = vmatpush1.bf16.msra.mxu0 %v1021_v40 }
  0x76   :  { %729 = vmatprep.subr.bf16.mxu0 %v1029_v41 }
  0x79   :  { %730 = vmatpush1.bf16.msra.mxu0 %v1027_v42 }
  0x7a   :  { %731 = vmatprep.subr.bf16.mxu0 %v1035_v43 }
  0x7d   :  { %732 = vmatpush1.bf16.msra.mxu0 %v1033_v44 }
  0x7e   :  { %733 = vmatprep.subr.bf16.mxu0 %v1041_v45 }
  0x81   :  { %734 = vmatpush1.bf16.msra.mxu0 %v1039_v46 }
  0x82   :  { %735 = vmatprep.subr.bf16.mxu0 %v1047_v47  ;;  %v381_v47 = vsub.s32 2, %v171_v31 }
  0x85   :  { %736 = vmatpush1.bf16.msra.mxu0 %v1045_v48  ;;  %v367_v48 = vld [vmem:[%s1317_s6] sm:$0xf]  ;;  %s1201_s6 = smov [#allocation10]  }
  0x86   :  { %737 = vmatprep.subr.bf16.mxu0 %v1053_v49  ;;  %v385_v49 = vsub.s32 3, %v171_v31  ;;  %s826_s8 = sshll.u32 %s1201_s6, 4  ;;  %s827_s8 = int_to_ptr.vmem [resolvable:$true] %s826_s8 }
  0x87   :  { %s1157_s9 = scalar_lea.vmem %s827_s8, 128  ;;  %p1162_p5 = scmp.lt.s32.totalorder %s827_s8, %s827_s8 }
  0x88   :  { %p1158_p4 = scmp.ne.s32.totalorder %s827_s8, %s1157_s9  ;;  %p1163_p6 = scmp.lt.s32.totalorder %s1157_s9, %s1157_s9 }
  0x89   :  { %738 = vmatpush1.bf16.msra.mxu0 %v1051_v50  ;;  %v1200_v50 = vmov 1983009808  }
  0x8a   :  { %739 = vmatprep.subr.bf16.mxu0 %v1059_v22  ;;  %p1164_p7 = por %p1163_p6, %p1162_p5 }
  0x8c   :  { %p1165_p8 = pnand %p1164_p7, %p1158_p4 }
  0x8d   :  { %740 = vmatpush1.bf16.msra.mxu0 %v1057_v24 }
  0x8e   :  { %741 = vmatprep.subr.bf16.mxu0 %v1065_v26 }
  0x91   :  { %742 = vmatpush1.bf16.msra.mxu0 %v1063_v28 }
 0x127   :  { %v144_v52 = vpop.f32.mrb[0].mxu0 }
 0x128   :  { %v145_v53 = vadd.f32 %v837_v51, %v144_v52  ;;  %v930_v54 = vpop.f32.mrb[1].mxu0  ;;  %v804_v51 = vunpack.c.l.s4 %v1200_v50  ;;  %v374_v52 = vrot.slane %v367_v48, %v172_v32 }
 0x129   :  { %v147_v55 = vpop.f32.mrb[2].mxu0  ;;  %v378_v54 = vrot.slane %v367_v48, %v176_v34 }
 0x12a   :  { %v150_v56 = vmax.f32 %v145_v53, 0.0  ;;  %v931_v57 = vpop.f32.mrb[3].mxu0  ;;  %v382_v53 = vrot.slane %v367_v48, %v381_v47  ;;  %v386_v55 = vrot.slane %v367_v48, %v385_v49 }
 0x12c   :  { %v168_v59 = vpack.c.bf16 %v150_v56, %v150_v56 }
 0x12e   :  { %293 = vmatmul.mubr.bf16.vlgmr.msra.gmra.mrb[0].mxu1 %v168_v59 }
 0x12f   :  { %753 = vmatpush1.bf16.msra.mxu1 %v976_v58  ;;  %v805_v58 = vunpack.c.0.s8 %v804_v51 }
 0x130   :  { %754 = vmatprep.subr.bf16.mxu1 %v984_v60 }
 0x133   :  { %755 = vmatpush1.bf16.msra.mxu1 %v982_v61 }
 0x134   :  { %756 = vmatprep.subr.bf16.mxu1 %v990_v62 }
 0x137   :  { %757 = vmatpush1.bf16.msra.mxu1 %v988_v63 }
 0x138   :  { %758 = vmatprep.subr.bf16.mxu1 %v996_v0 }
 0x13b   :  { %759 = vmatpush1.bf16.msra.mxu1 %v994_v1 }
 0x13c   :  { %760 = vmatprep.subr.bf16.mxu1 %v1002_v2 }
 0x13f   :  { %761 = vmatpush1.bf16.msra.mxu1 %v1000_v3 }
 0x140   :  { %762 = vmatprep.subr.bf16.mxu1 %v1008_v4 }
 0x143   :  { %763 = vmatpush1.bf16.msra.mxu1 %v1006_v5 }
 0x144   :  { %764 = vmatprep.subr.bf16.mxu1 %v1014_v6 }
 0x147   :  { %765 = vmatpush1.bf16.msra.mxu1 %v1012_v7 }
 0x148   :  { %766 = vmatprep.subr.bf16.mxu1 %v1020_v8  ;;  %v808_v8 = vsub.s32 %v805_v58, %v171_v31 }
 0x14b   :  { %767 = vmatpush1.bf16.msra.mxu1 %v1018_v9 }
 0x14c   :  { %768 = vmatprep.subr.bf16.mxu1 %v1026_v10 }
 0x14f   :  { %769 = vmatpush1.bf16.msra.mxu1 %v1024_v11 }
 0x150   :  { %770 = vmatprep.subr.bf16.mxu1 %v1032_v12 }
 0x153   :  { %771 = vmatpush1.bf16.msra.mxu1 %v1030_v13 }
 0x154   :  { %772 = vmatprep.subr.bf16.mxu1 %v1038_v14 }
 0x157   :  { %773 = vmatpush1.bf16.msra.mxu1 %v1036_v15 }
 0x158   :  { %774 = vmatprep.subr.bf16.mxu1 %v1044_v16 }
 0x15b   :  { %775 = vmatpush1.bf16.msra.mxu1 %v1042_v17 }
 0x15c   :  { %776 = vmatprep.subr.bf16.mxu1 %v1050_v18 }
 0x15f   :  { %777 = vmatpush1.bf16.msra.mxu1 %v1048_v19 }
 0x160   :  { %778 = vmatprep.subr.bf16.mxu1 %v1056_v20 }
 0x163   :  { %779 = vmatpush1.bf16.msra.mxu1 %v1054_v21 }
 0x164   :  { %780 = vmatprep.subr.bf16.mxu1 %v1062_v23 }
 0x167   :  { %781 = vmatpush1.bf16.msra.mxu1 %v1060_v25 }
 0x168   :  { %782 = vmatprep.subr.bf16.mxu1 %v1068_v27 }
 0x16b   :  { %783 = vmatpush1.bf16.msra.mxu1 %v1066_v29 }
 0x201   :  { %v294_v37 = vpop.f32.mrb[0].mxu1 }
 0x202   :  { %v295_v38 = vadd.f32 %v294_v37, %v173_v35  ;;  %v296_v39 = vpop.f32.mrb[1].mxu1 }
 0x203   :  { %v297_v40 = vadd.f32 %v296_v39, %v177_v36  ;;  %v298_v41 = vpop.f32.mrb[2].mxu1 }
 0x204   :  { %v301_v42 = vmax.f32 %v295_v38, 0.0  ;;  %v299_v43 = vpop.f32.mrb[3].mxu1 }
 0x205   :  { %v302_v44 = vmax.f32 %v297_v40, 0.0 }
 0x206   :  { %v368_v46 = vpack.c.bf16 %v301_v42, %v301_v42 }
 0x207   :  { %v369_v45 = vpack.c.bf16 %v302_v44, %v302_v44 }
 0x209   :  { %743 = vmatprep.mubr.bf16.mxu0 %v369_v45  ;;  %784 = vmatprep.mubr.bf16.mxu1 %v369_v45 }
 0x20a   :  { %744 = vmatmul.mubr.bf16.vlgmr.msra.gmra.mrb[4].mxu0 %v368_v46  ;;  %785 = vmatmul.mubr.bf16.vlgmr.msra.gmra.mrb[4].mxu1 %v368_v46 }
 0x2dd   :  { %v745_v56 = vpop.f32.mrb[4].mxu0  ;;  %v786_v57 = vpop.f32.mrb[4].mxu1 }
 0x2de   :  { %v746_v59 = vadd.f32 %v745_v56, %v374_v52  ;;  %v787_v60 = vadd.f32 %v786_v57, %v382_v53  ;;  %v747_v61 = vpop.f32.mrb[5].mxu0  ;;  %v788_v62 = vpop.f32.mrb[5].mxu1 }
 0x2df   :  { %v748_v63 = vadd.f32 %v747_v61, %v378_v54  ;;  %v789_v0 = vadd.f32 %v788_v62, %v386_v55  ;;  %v749_v1 = vpop.f32.mrb[6].mxu0  ;;  %v790_v2 = vpop.f32.mrb[6].mxu1 }
 0x2e0   :  { %v793_v3 = vmax.f32 %v746_v59, 0.0  ;;  %v795_v4 = vmax.f32 %v787_v60, 0.0  ;;  %v750_v5 = vpop.f32.mrb[7].mxu0  ;;  %v791_v6 = vpop.f32.mrb[7].mxu1 }
 0x2e1   :  { %v794_v7 = vmax.f32 %v748_v63, 0.0  ;;  %v796_v9 = vmax.f32 %v789_v0, 0.0 }
 0x2e3   :  { %v801_v10 = vcombine.low %v793_v3, %v794_v7  ;;  %v802_v11 = vcombine.low %v795_v4, %v796_v9 }
 0x2e5   :  { %v809_v12 = vrot.slane %v801_v10, %v808_v8  ;;  %v816_v13 = vrot.slane %v802_v11, %v808_v8 }
 0x2e7   :  { %v817_v14 = vcombine.low %v809_v12, %v816_v13 }
 0x2e9   :  { %819 = vst [vmem:[#allocation10] sm:$0xff] %v817_v14 }
 0x2ea   :  { %1168 = shalt.err (!%p1165_p8)
}
 0x2eb   :  { %s1169_s12 = scalar_lea.hbm %s1318_s7, 128 }
 0x2ec   :  { %p1170_p9 = scmp.ne.s32.totalorder %s1318_s7, %s1169_s12  ;;  %p1173_p10 = scmp.lt.u32.totalorder %s1169_s12, %s1318_s7 }
 0x2ee   :  { %p1175_p11 = pnand %p1173_p10, %p1170_p9 }
 0x2f0   :  { %1178 = shalt.err (!%p1175_p11)
}
 0x2f1   :  { %829 = dma.vmem_to_hbm [thread:$0]  %s827_s8, 128, %s1318_s7, [#allocation4]  }
 0x2f2   :  { %1185 = dma.done.wait [#allocation4], 128  }
 0x2f3   :  { %1186 = vsyncadd [#allocation4], 4294967168 }
 0x2f4   :  { %833 = vsyncpa [#allocation3], 1 }
 0x2f5   :  { %834 = vsyncpa [#allocation6], 1 }
 0x2f6   :  { %835 = vsyncpa [#allocation9], 1 }
 0x2f7   :  { %836 = vsyncpa [#allocation4], 1 }

// kernel: tpu_custom_call.1
= control target key start
LH: loop header
LB: loop body
LE: loop exit
PB: predicated region body
PF: predicated region fallthrough
CT: control target
= control target key end

     0   :  { %12 = vsyncpa [#allocation3], 0  ;;  %s1311_s0 = inlined_call_operand.hbm [shape: f32[2,32], index: 0, kind: input, shape index: {}]   ;;  %s1312_s1 = inlined_call_operand.hbm [shape: bf16[32,128], index: 1, kind: input, shape index: {}]   ;;  %s1313_s2 = inlined_call_operand.vmem [shape: f32[1,128], index: 2, kind: input, shape index: {}]   ;;  %s1314_s3 = inlined_call_operand.hbm [shape: bf16[128,256], index: 3, kind: input, shape index: {}]   ;;  %s1315_s4 = inlined_call_operand.vmem [shape: f32[1,256], index: 4, kind: input, shape index: {}]   ;;  %s1316_s5 = inlined_call_operand.hbm [shape: bf16[256,512], index: 5, kind: input, shape index: {}]   ;;  %s1317_s6 = inlined_call_operand.vmem [shape: f32[1,512], index: 6, kind: input, shape index: {}]   ;;  %s1318_s7 = inlined_call_operand.hbm [shape: f32[2,512], index: 7, kind: output, shape index: {}]  }
   0x1   :  { %13 = vsyncpa [#allocation6], 0 }
   0x2   :  { %14 = vsyncpa [#allocation9], 0 }
   0x3   :  { %15 = vsyncpa [#allocation4], 0  ;;  %s1187_s24 = smov [#allocation5]   ;;  %s1069_s28 = scalar_lea.hbm %s1312_s1, 256 }
   0x4   :  { %s31_s25 = sshll.u32 %s1187_s24, 4  ;;  %p1070_p0 = scmp.ne.s32.totalorder %s1312_s1, %s1069_s28  ;;  %s32_s25 = int_to_ptr.vmem [resolvable:$true] %s31_s25 }
   0x5   :  { %p1073_p1 = scmp.lt.u32.totalorder %s1069_s28, %s1312_s1 }
   0x7   :  { %p1075_p2 = pnand %p1073_p1, %p1070_p0 }
   0x9   :  { %1078 = shalt.err (!%p1075_p2)
}
   0xa   :  { %s1079_s10 = scalar_lea.vmem %s32_s25, 256  ;;  %p1084_p4 = scmp.lt.s32.totalorder %s32_s25, %s32_s25 }
   0xb   :  { %p1080_p3 = scmp.ne.s32.totalorder %s32_s25, %s1079_s10  ;;  %p1085_p5 = scmp.lt.s32.totalorder %s1079_s10, %s1079_s10 }
   0xd   :  { %p1086_p6 = por %p1085_p5, %p1084_p4 }
   0xf   :  { %p1087_p7 = pnand %p1086_p6, %p1080_p3 }
  0x11   :  { %1090 = shalt.err (!%p1087_p7)
}
  0x12   :  { %s1188_s11 = smov 64   ;;  %s1189_s12 = smov 4  }
  0x13   :  { %37 = dma.hbm_to_vmem [thread:$0]  %s1312_s1, 256, %s32_s25, [#allocation6], %s1188_s11, %s1188_s11, %s1189_s12  }
  0x14   :  { %s1190_s15 = smov [#allocation2]   ;;  %s1191_s17 = smov [#allocation7]  }
  0x15   :  { %s22_s16 = sshll.u32 %s1190_s15, 4  ;;  %s45_s18 = sshll.u32 %s1191_s17, 4  ;;  %s23_s16 = int_to_ptr.vmem [resolvable:$true] %s22_s16  ;;  %s46_s18 = int_to_ptr.vmem [resolvable:$true] %s45_s18 }
  0x16   :  { %s1091_s21 = scalar_lea.hbm %s1311_s0, 32 }
  0x17   :  { %p1092_p8 = scmp.ne.s32.totalorder %s1311_s0, %s1091_s21  ;;  %p1095_p9 = scmp.lt.u32.totalorder %s1091_s21, %s1311_s0 }
  0x19   :  { %p1097_p10 = pnand %p1095_p9, %p1092_p8 }
  0x1b   :  { %1100 = shalt.err (!%p1097_p10)
}
  0x1c   :  { %s1101_s1 = scalar_lea.vmem %s23_s16, 32  ;;  %p1106_p12 = scmp.lt.s32.totalorder %s23_s16, %s23_s16 }
  0x1d   :  { %p1102_p11 = scmp.ne.s32.totalorder %s23_s16, %s1101_s1  ;;  %p1107_p13 = scmp.lt.s32.totalorder %s1101_s1, %s1101_s1 }
  0x1f   :  { %p1108_p0 = por %p1107_p13, %p1106_p12 }
  0x21   :  { %p1109_p1 = pnand %p1108_p0, %p1102_p11 }
  0x23   :  { %1112 = shalt.err (!%p1109_p1)
}
  0x24   :  { %25 = dma.hbm_to_vmem [thread:$0]  %s1311_s0, 32, %s23_s16, [#allocation3]  }
  0x25   :  { %s1113_s30 = scalar_lea.hbm %s1314_s3, 2048 }
  0x26   :  { %p1114_p2 = scmp.ne.s32.totalorder %s1314_s3, %s1113_s30  ;;  %p1117_p3 = scmp.lt.u32.totalorder %s1113_s30, %s1314_s3 }
  0x28   :  { %p1119_p4 = pnand %p1117_p3, %p1114_p2 }
  0x2a   :  { %1122 = shalt.err (!%p1119_p4)
}
  0x2b   :  { %s1123_s12 = scalar_lea.vmem %s46_s18, 2048  ;;  %p1128_p6 = scmp.lt.s32.totalorder %s46_s18, %s46_s18 }
  0x2c   :  { %p1124_p5 = scmp.ne.s32.totalorder %s46_s18, %s1123_s12  ;;  %p1129_p7 = scmp.lt.s32.totalorder %s1123_s12, %s1123_s12 }
  0x2e   :  { %p1130_p8 = por %p1129_p7, %p1128_p6 }
  0x30   :  { %p1131_p9 = pnand %p1130_p8, %p1124_p5 }
  0x32   :  { %1134 = shalt.err (!%p1131_p9)
}
  0x33   :  { %s1192_s0 = smov 128   ;;  %s1193_s13 = smov 8  }
  0x34   :  { %51 = dma.hbm_to_vmem [thread:$0]  %s1314_s3, 2048, %s46_s18, [#allocation6], %s1192_s0, %s1192_s0, %s1193_s13  }
  0x35   :  { %s1194_s16 = smov [#allocation8]   ;;  %s1135_s21 = scalar_lea.hbm %s1316_s5, 8192 }
  0x36   :  { %s59_s17 = sshll.u32 %s1194_s16, 4  ;;  %p1136_p10 = scmp.ne.s32.totalorder %s1316_s5, %s1135_s21  ;;  %s60_s17 = int_to_ptr.vmem [resolvable:$true] %s59_s17 }
  0x37   :  { %p1139_p11 = scmp.lt.u32.totalorder %s1135_s21, %s1316_s5 }
  0x39   :  { %p1141_p12 = pnand %p1139_p11, %p1136_p10 }
  0x3b   :  { %1144 = shalt.err (!%p1141_p12)
}
  0x3c   :  { %s1145_s1 = scalar_lea.vmem %s60_s17, 8192  ;;  %p1150_p0 = scmp.lt.s32.totalorder %s60_s17, %s60_s17 }
  0x3d   :  { %p1146_p13 = scmp.ne.s32.totalorder %s60_s17, %s1145_s1  ;;  %p1151_p1 = scmp.lt.s32.totalorder %s1145_s1, %s1145_s1 }
  0x3f   :  { %p1152_p2 = por %p1151_p1, %p1150_p0 }
  0x41   :  { %p1153_p3 = pnand %p1152_p2, %p1146_p13 }
  0x43   :  { %1156 = shalt.err (!%p1153_p3)
}
  0x44   :  { %s1195_s3 = smov 256   ;;  %s1196_s18 = smov 16  }
  0x45   :  { %65 = dma.hbm_to_vmem [thread:$0]  %s1316_s5, 8192, %s60_s17, [#allocation9], %s1195_s3, %s1195_s3, %s1196_s18  }
  0x46   :  { %1179 = dma.done.wait [#allocation3], 32  }
  0x47   :  { %1180 = vsyncadd [#allocation3], 4294967264 }
  0x48   :  { %1181 = dma.done.wait [#allocation6], 2304  }
  0x49   :  { %1182 = vsyncadd [#allocation6], 4294964992 }
  0x4a   :  { %1183 = dma.done.wait [#allocation9], 8192  }
  0x4b   :  { %1184 = vsyncadd [#allocation9], 4294959104  ;;  %v1197_v0 = vmov 0.0   ;;  %vm1198_vm0 = vmmov 0   ;;  %v947_v1 = vld [vmem:[#allocation5] sm:$0xff]   ;;  %v948_v2 = vld [vmem:[#allocation5 + $0x8] sm:$0xff]  }
  0x4c   :  { %924 = vmatprep.subr.bf16.mxu0 %v1197_v0  ;;  %928 = vmatprep.mubr.msk.bf16.mxu0 %vm1198_vm0, %v1197_v0  ;;  %v81_v3 = vld [vmem:[#allocation2] sm:$0x3]  ;;  %v951_v5 = vld [vmem:[#allocation7] ss:$8 sps:$4 sm:$0xff]   ;;  %v952_v6 = vld [vmem:[#allocation7 + $0x14] ss:$8 sps:$4 sm:$0xff]  }
  0x4d   :  { %925 = vmatpush3.bf16.msra.mxu0 %v947_v1  ;;  %v949_v4 = vld [vmem:[#allocation7 + $0x4] ss:$8 sps:$4 sm:$0xff]   ;;  %v87_v7 = vpack.c.bf16 %v81_v3, %v81_v3  ;;  %vm106_vm1 = vcmask 261120   ;;  %v954_v8 = vld [vmem:[#allocation7 + $0x10] ss:$8 sps:$4 sm:$0xff]   ;;  %v1199_v21 = vmov 0  }
  0x4e   :  { %926 = vmatprep.subr.bf16.mxu0 %v1197_v0  ;;  %260 = vmatprep.subr.bf16.mxu1 %v949_v4  ;;  %v955_v9 = vld [vmem:[#allocation7 + $0x24] ss:$8 sps:$4 sm:$0xff]   ;;  %v957_v10 = vld [vmem:[#allocation7 + $0x20] ss:$8 sps:$4 sm:$0xff]   ;;  %v958_v11 = vld [vmem:[#allocation7 + $0x34] ss:$8 sps:$4 sm:$0xff]  }
  0x4f   :  { %261 = vmatpush1.bf16.msra.mxu1 %v951_v5  ;;  %v960_v12 = vld [vmem:[#allocation7 + $0x30] ss:$8 sps:$4 sm:$0xff]   ;;  %v961_v13 = vld [vmem:[#allocation7 + $0x44] ss:$8 sps:$4 sm:$0xff]   ;;  %v963_v14 = vld [vmem:[#allocation7 + $0x40] ss:$8 sps:$4 sm:$0xff]   ;;  %292 = vmatprep.mubr.bf16.mxu1 %v1199_v21 }
  0x50   :  { %262 = vmatprep.subr.bf16.mxu1 %v952_v6  ;;  %v964_v15 = vld [vmem:[#allocation7 + $0x54] ss:$8 sps:$4 sm:$0xff]   ;;  %v966_v16 = vld [vmem:[#allocation7 + $0x50] ss:$8 sps:$4 sm:$0xff]   ;;  %v967_v17 = vld [vmem:[#allocation7 + $0x64] ss:$8 sps:$4 sm:$0xff]  }
  0x51   :  { %927 = vmatpush3.bf16.msra.mxu0 %v948_v2  ;;  %v969_v18 = vld [vmem:[#allocation7 + $0x60] ss:$8 sps:$4 sm:$0xff]   ;;  %v970_v19 = vld [vmem:[#allocation7 + $0x74] ss:$8 sps:$4 sm:$0xff]   ;;  %v972_v20 = vld [vmem:[#allocation7 + $0x70] ss:$8 sps:$4 sm:$0xff]  }
  0x52   :  { %v973_v22 = vld [vmem:[#allocation8] ss:$16 sps:$4 sm:$0xff]   ;;  %v975_v23 = vld [vmem:[#allocation8 + $0x4] ss:$16 sps:$4 sm:$0xff]   ;;  %v978_v24 = vld [vmem:[#allocation8 + $0xc] ss:$16 sps:$4 sm:$0xff]  }
  0x53   :  { %263 = vmatpush1.bf16.msra.mxu1 %v954_v8  ;;  %v981_v25 = vld [vmem:[#allocation8 + $0x24] ss:$16 sps:$4 sm:$0xff]   ;;  %711 = vmatprep.subr.bf16.mxu0 %v975_v23  ;;  %v979_v26 = vld [vmem:[#allocation8 + $0x20] ss:$16 sps:$4 sm:$0xff]   ;;  %v976_v58 = vld [vmem:[#allocation8 + $0x8] ss:$16 sps:$4 sm:$0xff]  }
  0x54   :  { %929 = vmatmul.mubr.msk.bf16.vlgmr.msra.gmra.mrb[0].mxu0 %vm106_vm1, %v87_v7  ;;  %264 = vmatprep.subr.bf16.mxu1 %v955_v9  ;;  %v987_v27 = vld [vmem:[#allocation8 + $0x44] ss:$16 sps:$4 sm:$0xff]   ;;  %v985_v28 = vld [vmem:[#allocation8 + $0x40] ss:$16 sps:$4 sm:$0xff]   ;;  %v984_v60 = vld [vmem:[#allocation8 + $0x2c] ss:$16 sps:$4 sm:$0xff]  }
  0x55   :  { %712 = vmatpush1.bf16.msra.mxu0 %v973_v22  ;;  %v993_v29 = vld [vmem:[#allocation8 + $0x64] ss:$16 sps:$4 sm:$0xff]   ;;  %v991_v30 = vld [vmem:[#allocation8 + $0x60] ss:$16 sps:$4 sm:$0xff]   ;;  %v982_v61 = vld [vmem:[#allocation8 + $0x28] ss:$16 sps:$4 sm:$0xff]  }
  0x56   :  { %713 = vmatprep.subr.bf16.mxu0 %v981_v25  ;;  %v999_v31 = vld [vmem:[#allocation8 + $0x84] ss:$16 sps:$4 sm:$0xff]   ;;  %v997_v32 = vld [vmem:[#allocation8 + $0x80] ss:$16 sps:$4 sm:$0xff]   ;;  %v990_v62 = vld [vmem:[#allocation8 + $0x4c] ss:$16 sps:$4 sm:$0xff]  }
  0x57   :  { %265 = vmatpush1.bf16.msra.mxu1 %v957_v10  ;;  %v1005_v33 = vld [vmem:[#allocation8 + $0xa4] ss:$16 sps:$4 sm:$0xff]   ;;  %v1003_v34 = vld [vmem:[#allocation8 + $0xa0] ss:$16 sps:$4 sm:$0xff]   ;;  %v988_v63 = vld [vmem:[#allocation8 + $0x48] ss:$16 sps:$4 sm:$0xff]  }
  0x58   :  { %266 = vmatprep.subr.bf16.mxu1 %v958_v11  ;;  %v1011_v35 = vld [vmem:[#allocation8 + $0xc4] ss:$16 sps:$4 sm:$0xff]   ;;  %v1009_v36 = vld [vmem:[#allocation8 + $0xc0] ss:$16 sps:$4 sm:$0xff]   ;;  %v996_v0 = vld [vmem:[#allocation8 + $0x6c] ss:$16 sps:$4 sm:$0xff]  }
  0x59   :  { %714 = vmatpush1.bf16.msra.mxu0 %v979_v26  ;;  %v1017_v37 = vld [vmem:[#allocation8 + $0xe4] ss:$16 sps:$4 sm:$0xff]   ;;  %v1015_v38 = vld [vmem:[#allocation8 + $0xe0] ss:$16 sps:$4 sm:$0xff]   ;;  %v994_v1 = vld [vmem:[#allocation8 + $0x68] ss:$16 sps:$4 sm:$0xff]  }
  0x5a   :  { %715 = vmatprep.subr.bf16.mxu0 %v987_v27  ;;  %v1023_v39 = vld [vmem:[#allocation8 + $0x104] ss:$16 sps:$4 sm:$0xff]   ;;  %v1021_v40 = vld [vmem:[#allocation8 + $0x100] ss:$16 sps:$4 sm:$0xff]   ;;  %v1002_v2 = vld [vmem:[#allocation8 + $0x8c] ss:$16 sps:$4 sm:$0xff]  }
  0x5b   :  { %267 = vmatpush1.bf16.msra.mxu1 %v960_v12  ;;  %v1029_v41 = vld [vmem:[#allocation8 + $0x124] ss:$16 sps:$4 sm:$0xff]   ;;  %v1027_v42 = vld [vmem:[#allocation8 + $0x120] ss:$16 sps:$4 sm:$0xff]   ;;  %v1000_v3 = vld [vmem:[#allocation8 + $0x88] ss:$16 sps:$4 sm:$0xff]  }
  0x5c   :  { %268 = vmatprep.subr.bf16.mxu1 %v961_v13  ;;  %v1035_v43 = vld [vmem:[#allocation8 + $0x144] ss:$16 sps:$4 sm:$0xff]   ;;  %v1033_v44 = vld [vmem:[#allocation8 + $0x140] ss:$16 sps:$4 sm:$0xff]   ;;  %v1008_v4 = vld [vmem:[#allocation8 + $0xac] ss:$16 sps:$4 sm:$0xff]  }
  0x5d   :  { %716 = vmatpush1.bf16.msra.mxu0 %v985_v28  ;;  %v1041_v45 = vld [vmem:[#allocation8 + $0x164] ss:$16 sps:$4 sm:$0xff]   ;;  %v1039_v46 = vld [vmem:[#allocation8 + $0x160] ss:$16 sps:$4 sm:$0xff]   ;;  %v1006_v5 = vld [vmem:[#allocation8 + $0xa8] ss:$16 sps:$4 sm:$0xff]  }
  0x5e   :  { %717 = vmatprep.subr.bf16.mxu0 %v993_v29  ;;  %v1047_v47 = vld [vmem:[#allocation8 + $0x184] ss:$16 sps:$4 sm:$0xff]   ;;  %v1045_v48 = vld [vmem:[#allocation8 + $0x180] ss:$16 sps:$4 sm:$0xff]   ;;  %v1014_v6 = vld [vmem:[#allocation8 + $0xcc] ss:$16 sps:$4 sm:$0xff]  }
  0x5f   :  { %269 = vmatpush1.bf16.msra.mxu1 %v963_v14  ;;  %v1053_v49 = vld [vmem:[#allocation8 + $0x1a4] ss:$16 sps:$4 sm:$0xff]   ;;  %v1051_v50 = vld [vmem:[#allocation8 + $0x1a0] ss:$16 sps:$4 sm:$0xff]   ;;  %v1012_v7 = vld [vmem:[#allocation8 + $0xc8] ss:$16 sps:$4 sm:$0xff]  }
  0x60   :  { %270 = vmatprep.subr.bf16.mxu1 %v964_v15  ;;  %v837_v51 = vld [vmem:[%s1313_s2] ss:$0 sm:$0xff]  ;;  %v1020_v8 = vld [vmem:[#allocation8 + $0xec] ss:$16 sps:$4 sm:$0xff]   ;;  %v1018_v9 = vld [vmem:[#allocation8 + $0xe8] ss:$16 sps:$4 sm:$0xff]  }
  0x61   :  { %718 = vmatpush1.bf16.msra.mxu0 %v991_v30  ;;  %v1026_v10 = vld [vmem:[#allocation8 + $0x10c] ss:$16 sps:$4 sm:$0xff]   ;;  %v1024_v11 = vld [vmem:[#allocation8 + $0x108] ss:$16 sps:$4 sm:$0xff]   ;;  %v1059_v22 = vld [vmem:[#allocation8 + $0x1c4] ss:$16 sps:$4 sm:$0xff]   ;;  %v170_v30 = vlaneseq }
  0x62   :  { %719 = vmatprep.subr.bf16.mxu0 %v999_v31  ;;  %v1032_v12 = vld [vmem:[#allocation8 + $0x12c] ss:$16 sps:$4 sm:$0xff]   ;;  %v1030_v13 = vld [vmem:[#allocation8 + $0x128] ss:$16 sps:$4 sm:$0xff]   ;;  %v1065_v26 = vld [vmem:[#allocation8 + $0x1e4] ss:$16 sps:$4 sm:$0xff]  }
  0x63   :  { %271 = vmatpush1.bf16.msra.mxu1 %v966_v16  ;;  %v1038_v14 = vld [vmem:[#allocation8 + $0x14c] ss:$16 sps:$4 sm:$0xff]   ;;  %v1036_v15 = vld [vmem:[#allocation8 + $0x148] ss:$16 sps:$4 sm:$0xff]   ;;  %v1063_v28 = vld [vmem:[#allocation8 + $0x1e0] ss:$16 sps:$4 sm:$0xff]  }
  0x64   :  { %272 = vmatprep.subr.bf16.mxu1 %v967_v17  ;;  %v1044_v16 = vld [vmem:[#allocation8 + $0x16c] ss:$16 sps:$4 sm:$0xff]   ;;  %v1042_v17 = vld [vmem:[#allocation8 + $0x168] ss:$16 sps:$4 sm:$0xff]   ;;  %v171_v31 = vshrl.u32 %v170_v30, 7 }
  0x65   :  { %720 = vmatpush1.bf16.msra.mxu0 %v997_v32  ;;  %v1054_v21 = vld [vmem:[#allocation8 + $0x1a8] ss:$16 sps:$4 sm:$0xff]   ;;  %v1062_v23 = vld [vmem:[#allocation8 + $0x1cc] ss:$16 sps:$4 sm:$0xff]  }
  0x66   :  { %721 = vmatprep.subr.bf16.mxu0 %v1005_v33  ;;  %v1060_v25 = vld [vmem:[#allocation8 + $0x1c8] ss:$16 sps:$4 sm:$0xff]   ;;  %v1068_v27 = vld [vmem:[#allocation8 + $0x1ec] ss:$16 sps:$4 sm:$0xff]   ;;  %v172_v32 = vsub.s32 0, %v171_v31 }
  0x67   :  { %273 = vmatpush1.bf16.msra.mxu1 %v969_v18  ;;  %v1050_v18 = vld [vmem:[#allocation8 + $0x18c] ss:$16 sps:$4 sm:$0xff]   ;;  %v1066_v29 = vld [vmem:[#allocation8 + $0x1e8] ss:$16 sps:$4 sm:$0xff]   ;;  %v167_v33 = vld [vmem:[%s1315_s4] sm:$0x3] }
  0x68   :  { %274 = vmatprep.subr.bf16.mxu1 %v970_v19  ;;  %v1048_v19 = vld [vmem:[#allocation8 + $0x188] ss:$16 sps:$4 sm:$0xff]  }
  0x69   :  { %722 = vmatpush1.bf16.msra.mxu0 %v1003_v34  ;;  %v176_v34 = vsub.s32 1, %v171_v31 }
  0x6a   :  { %723 = vmatprep.subr.bf16.mxu0 %v1011_v35  ;;  %v173_v35 = vrot.slane %v167_v33, %v172_v32 }
  0x6b   :  { %275 = vmatpush1.bf16.msra.mxu1 %v972_v20  ;;  %v1056_v20 = vld [vmem:[#allocation8 + $0x1ac] ss:$16 sps:$4 sm:$0xff]  }
  0x6c   :  { %752 = vmatprep.subr.bf16.mxu1 %v978_v24  ;;  %v1057_v24 = vld [vmem:[#allocation8 + $0x1c0] ss:$16 sps:$4 sm:$0xff]  }
  0x6d   :  { %724 = vmatpush1.bf16.msra.mxu0 %v1009_v36  ;;  %v177_v36 = vrot.slane %v167_v33, %v176_v34 }
  0x6e   :  { %725 = vmatprep.subr.bf16.mxu0 %v1017_v37 }
  0x71   :  { %726 = vmatpush1.bf16.msra.mxu0 %v1015_v38 }
  0x72   :  { %727 = vmatprep.subr.bf16.mxu0 %v1023_v39 }
  0x75   :  { %728 = vmatpush1.bf16.msra.mxu0 %v1021_v40 }
  0x76   :  { %729 = vmatprep.subr.bf16.mxu0 %v1029_v41 }
  0x79   :  { %730 = vmatpush1.bf16.msra.mxu0 %v1027_v42 }
  0x7a   :  { %731 = vmatprep.subr.bf16.mxu0 %v1035_v43 }
  0x7d   :  { %732 = vmatpush1.bf16.msra.mxu0 %v1033_v44 }
  0x7e   :  { %733 = vmatprep.subr.bf16.mxu0 %v1041_v45 }
  0x81   :  { %734 = vmatpush1.bf16.msra.mxu0 %v1039_v46 }
  0x82   :  { %735 = vmatprep.subr.bf16.mxu0 %v1047_v47  ;;  %v381_v47 = vsub.s32 2, %v171_v31 }
  0x85   :  { %736 = vmatpush1.bf16.msra.mxu0 %v1045_v48  ;;  %v367_v48 = vld [vmem:[%s1317_s6] sm:$0xf]  ;;  %s1201_s6 = smov [#allocation10]  }
  0x86   :  { %737 = vmatprep.subr.bf16.mxu0 %v1053_v49  ;;  %v385_v49 = vsub.s32 3, %v171_v31  ;;  %s826_s8 = sshll.u32 %s1201_s6, 4  ;;  %s827_s8 = int_to_ptr.vmem [resolvable:$true] %s826_s8 }
  0x87   :  { %s1157_s9 = scalar_lea.vmem %s827_s8, 128  ;;  %p1162_p5 = scmp.lt.s32.totalorder %s827_s8, %s827_s8 }
  0x88   :  { %p1158_p4 = scmp.ne.s32.totalorder %s827_s8, %s1157_s9  ;;  %p1163_p6 = scmp.lt.s32.totalorder %s1157_s9, %s1157_s9 }
  0x89   :  { %738 = vmatpush1.bf16.msra.mxu0 %v1051_v50  ;;  %v1200_v50 = vmov 1983009808  }
  0x8a   :  { %739 = vmatprep.subr.bf16.mxu0 %v1059_v22  ;;  %p1164_p7 = por %p1163_p6, %p1162_p5 }
  0x8c   :  { %p1165_p8 = pnand %p1164_p7, %p1158_p4 }
  0x8d   :  { %740 = vmatpush1.bf16.msra.mxu0 %v1057_v24 }
  0x8e   :  { %741 = vmatprep.subr.bf16.mxu0 %v1065_v26 }
  0x91   :  { %742 = vmatpush1.bf16.msra.mxu0 %v1063_v28 }
 0x127   :  { %v144_v52 = vpop.f32.mrb[0].mxu0 }
 0x128   :  { %v145_v53 = vadd.f32 %v837_v51, %v144_v52  ;;  %v930_v54 = vpop.f32.mrb[1].mxu0  ;;  %v804_v51 = vunpack.c.l.s4 %v1200_v50  ;;  %v374_v52 = vrot.slane %v367_v48, %v172_v32 }
 0x129   :  { %v147_v55 = vpop.f32.mrb[2].mxu0  ;;  %v378_v54 = vrot.slane %v367_v48, %v176_v34 }
 0x12a   :  { %v150_v56 = vmax.f32 %v145_v53, 0.0  ;;  %v931_v57 = vpop.f32.mrb[3].mxu0  ;;  %v382_v53 = vrot.slane %v367_v48, %v381_v47  ;;  %v386_v55 = vrot.slane %v367_v48, %v385_v49 }
 0x12c   :  { %v168_v59 = vpack.c.bf16 %v150_v56, %v150_v56 }
 0x12e   :  { %293 = vmatmul.mubr.bf16.vlgmr.msra.gmra.mrb[0].mxu1 %v168_v59 }
 0x12f   :  { %753 = vmatpush1.bf16.msra.mxu1 %v976_v58  ;;  %v805_v58 = vunpack.c.0.s8 %v804_v51 }
 0x130   :  { %754 = vmatprep.subr.bf16.mxu1 %v984_v60 }
 0x133   :  { %755 = vmatpush1.bf16.msra.mxu1 %v982_v61 }
 0x134   :  { %756 = vmatprep.subr.bf16.mxu1 %v990_v62 }
 0x137   :  { %757 = vmatpush1.bf16.msra.mxu1 %v988_v63 }
 0x138   :  { %758 = vmatprep.subr.bf16.mxu1 %v996_v0 }
 0x13b   :  { %759 = vmatpush1.bf16.msra.mxu1 %v994_v1 }
 0x13c   :  { %760 = vmatprep.subr.bf16.mxu1 %v1002_v2 }
 0x13f   :  { %761 = vmatpush1.bf16.msra.mxu1 %v1000_v3 }
 0x140   :  { %762 = vmatprep.subr.bf16.mxu1 %v1008_v4 }
 0x143   :  { %763 = vmatpush1.bf16.msra.mxu1 %v1006_v5 }
 0x144   :  { %764 = vmatprep.subr.bf16.mxu1 %v1014_v6 }
 0x147   :  { %765 = vmatpush1.bf16.msra.mxu1 %v1012_v7 }
 0x148   :  { %766 = vmatprep.subr.bf16.mxu1 %v1020_v8  ;;  %v808_v8 = vsub.s32 %v805_v58, %v171_v31 }
 0x14b   :  { %767 = vmatpush1.bf16.msra.mxu1 %v1018_v9 }
 0x14c   :  { %768 = vmatprep.subr.bf16.mxu1 %v1026_v10 }
 0x14f   :  { %769 = vmatpush1.bf16.msra.mxu1 %v1024_v11 }
 0x150   :  { %770 = vmatprep.subr.bf16.mxu1 %v1032_v12 }
 0x153   :  { %771 = vmatpush1.bf16.msra.mxu1 %v1030_v13 }
 0x154   :  { %772 = vmatprep.subr.bf16.mxu1 %v1038_v14 }
 0x157   :  { %773 = vmatpush1.bf16.msra.mxu1 %v1036_v15 }
 0x158   :  { %774 = vmatprep.subr.bf16.mxu1 %v1044_v16 }
 0x15b   :  { %775 = vmatpush1.bf16.msra.mxu1 %v1042_v17 }
 0x15c   :  { %776 = vmatprep.subr.bf16.mxu1 %v1050_v18 }
 0x15f   :  { %777 = vmatpush1.bf16.msra.mxu1 %v1048_v19 }
 0x160   :  { %778 = vmatprep.subr.bf16.mxu1 %v1056_v20 }
 0x163   :  { %779 = vmatpush1.bf16.msra.mxu1 %v1054_v21 }
 0x164   :  { %780 = vmatprep.subr.bf16.mxu1 %v1062_v23 }
 0x167   :  { %781 = vmatpush1.bf16.msra.mxu1 %v1060_v25 }
 0x168   :  { %782 = vmatprep.subr.bf16.mxu1 %v1068_v27 }
 0x16b   :  { %783 = vmatpush1.bf16.msra.mxu1 %v1066_v29 }
 0x201   :  { %v294_v37 = vpop.f32.mrb[0].mxu1 }
 0x202   :  { %v295_v38 = vadd.f32 %v294_v37, %v173_v35  ;;  %v296_v39 = vpop.f32.mrb[1].mxu1 }
 0x203   :  { %v297_v40 = vadd.f32 %v296_v39, %v177_v36  ;;  %v298_v41 = vpop.f32.mrb[2].mxu1 }
 0x204   :  { %v301_v42 = vmax.f32 %v295_v38, 0.0  ;;  %v299_v43 = vpop.f32.mrb[3].mxu1 }
 0x205   :  { %v302_v44 = vmax.f32 %v297_v40, 0.0 }
 0x206   :  { %v368_v46 = vpack.c.bf16 %v301_v42, %v301_v42 }
 0x207   :  { %v369_v45 = vpack.c.bf16 %v302_v44, %v302_v44 }
 0x209   :  { %743 = vmatprep.mubr.bf16.mxu0 %v369_v45  ;;  %784 = vmatprep.mubr.bf16.mxu1 %v369_v45 }
 0x20a   :  { %744 = vmatmul.mubr.bf16.vlgmr.msra.gmra.mrb[4].mxu0 %v368_v46  ;;  %785 = vmatmul.mubr.bf16.vlgmr.msra.gmra.mrb[4].mxu1 %v368_v46 }
 0x2dd   :  { %v745_v56 = vpop.f32.mrb[4].mxu0  ;;  %v786_v57 = vpop.f32.mrb[4].mxu1 }
 0x2de   :  { %v746_v59 = vadd.f32 %v745_v56, %v374_v52  ;;  %v787_v60 = vadd.f32 %v786_v57, %v382_v53  ;;  %v747_v61 = vpop.f32.mrb[5].mxu0  ;;  %v788_v62 = vpop.f32.mrb[5].mxu1 }
 0x2df   :  { %v748_v63 = vadd.f32 %v747_v61, %v378_v54  ;;  %v789_v0 = vadd.f32 %v788_v62, %v386_v55  ;;  %v749_v1 = vpop.f32.mrb[6].mxu0  ;;  %v790_v2 = vpop.f32.mrb[6].mxu1 }
 0x2e0   :  { %v793_v3 = vmax.f32 %v746_v59, 0.0  ;;  %v795_v4 = vmax.f32 %v787_v60, 0.0  ;;  %v750_v5 = vpop.f32.mrb[7].mxu0  ;;  %v791_v6 = vpop.f32.mrb[7].mxu1 }
 0x2e1   :  { %v794_v7 = vmax.f32 %v748_v63, 0.0  ;;  %v796_v9 = vmax.f32 %v789_v0, 0.0 }
 0x2e3   :  { %v801_v10 = vcombine.low %v793_v3, %v794_v7  ;;  %v802_v11 = vcombine.low %v795_v4, %v796_v9 }
 0x2e5   :  { %v809_v12 = vrot.slane %v801_v10, %v808_v8  ;;  %v816_v13 = vrot.slane %v802_v11, %v808_v8 }
 0x2e7   :  { %v817_v14 = vcombine.low %v809_v12, %v816_v13 }
 0x2e9   :  { %819 = vst [vmem:[#allocation10] sm:$0xff] %v817_v14 }
 0x2ea   :  { %1168 = shalt.err (!%p1165_p8)
}
 0x2eb   :  { %s1169_s12 = scalar_lea.hbm %s1318_s7, 128 }
 0x2ec   :  { %p1170_p9 = scmp.ne.s32.totalorder %s1318_s7, %s1169_s12  ;;  %p1173_p10 = scmp.lt.u32.totalorder %s1169_s12, %s1318_s7 }
 0x2ee   :  { %p1175_p11 = pnand %p1173_p10, %p1170_p9 }
 0x2f0   :  { %1178 = shalt.err (!%p1175_p11)
}
 0x2f1   :  { %829 = dma.vmem_to_hbm [thread:$0]  %s827_s8, 128, %s1318_s7, [#allocation4]  }
 0x2f2   :  { %1185 = dma.done.wait [#allocation4], 128  }
 0x2f3   :  { %1186 = vsyncadd [#allocation4], 4294967168 }
 0x2f4   :  { %833 = vsyncpa [#allocation3], 1 }
 0x2f5   :  { %834 = vsyncpa [#allocation6], 1 }
 0x2f6   :  { %835 = vsyncpa [#allocation9], 1 }
 0x2f7   :  { %836 = vsyncpa [#allocation4], 1 }

</bundles_post_ra>
